<compile_context>
chip_gen: v7x
topology: tpu7x:2x2x1
jax: 0.10.0
libtpu: 0.0.40
codegen_flags: <defaults>
</compile_context>

<pallas_src>
import jax
import jax.numpy as jnp
from jax.experimental import pallas as pl
from jax.experimental.pallas import tpu as pltpu


def _invconv_kernel_vpu(x_ref, w_ref, o_ref):
    # x_ref : (1, C, T)  spatial tile, channels on sublanes, pixels on lanes
    # w_ref : (C, C)     conv weight (out_ch, in_ch), resident across the grid
    # o_ref : (1, C, T)
    x = x_ref[0]                             # (C, T)
    w = w_ref[...].astype(jnp.float32)       # (C, C)
    c = x.shape[0]
    # out[o, :] = sum_i w[o, i] * x[i, :]  -- C broadcasted VPU FMAs, no MXU.
    acc = w[:, 0:1] * x[0:1, :].astype(jnp.float32)
    for i in range(1, c):
        acc = acc + w[:, i:i + 1] * x[i:i + 1, :].astype(jnp.float32)
    o_ref[0] = acc.astype(o_ref.dtype)


def _invconv_kernel_mxu(x_ref, w_ref, o_ref):
    # Larger C: the (C, C) x (C, T) matmul maps well onto the MXU.
    o_ref[0] = jnp.dot(
        w_ref[...], x_ref[0], preferred_element_type=jnp.float32
    ).astype(o_ref.dtype)


def inv_conv2d_forward(x_nchw, weight):
    """weight: (C, C) = squeezed (C, C, 1, 1) conv kernel (out_ch, in_ch)."""
    N, C, H, W = x_nchw.shape
    S = H * W

    # NCHW-native: (N, C, H, W) -> (N, C, H*W) is a contiguous (free) reshape.
    x_ncs = x_nchw.reshape(N, C, S)

    # Spatial (lane) tile: large multiple of 128 to amortize per-step overhead,
    # but bounded so double-buffered in + out blocks stay well under the
    # default scoped VMEM budget on every generation (notably v7x's 64 MiB).
    if S <= 4096:
        tile_s = S                      # full spatial extent (always legal)
    else:
        tile_s = 4096
        # conservative budget: 2x in + 2x out buffers of C*tile_s f32 <= ~16 MiB
        max_elems = (16 * 1024 * 1024) // (4 * 4 * C)
        while tile_s > 128 and tile_s > max_elems:
            tile_s //= 2
    grid = (N, pl.cdiv(S, tile_s))      # ragged last spatial block is handled

    kernel = _invconv_kernel_vpu if C <= 8 else _invconv_kernel_mxu

    out_ncs = pl.pallas_call(
        kernel,
        out_shape=jax.ShapeDtypeStruct((N, C, S), x_nchw.dtype),
        grid_spec=pltpu.PrefetchScalarGridSpec(
            num_scalar_prefetch=0,
            grid=grid,
            in_specs=[
                pl.BlockSpec((1, C, tile_s), lambda n, s: (n, 0, s)),
                pl.BlockSpec((C, C), lambda n, s: (0, 0)),
            ],
            out_specs=pl.BlockSpec((1, C, tile_s), lambda n, s: (n, 0, s)),
        ),
        compiler_params=pltpu.CompilerParams(
            dimension_semantics=("parallel", "parallel"),
        ),
    )(x_ncs, weight)

    out = out_ncs.reshape(N, C, H, W)

    # TODO(synk): slogdet (LU decomposition) of the tiny CxC weight has no clean
    # Pallas equivalent; computed in plain JAX (float32 instead of PyTorch's
    # .double() cast — same value up to fp precision).
    logdet = (H * W) * jnp.linalg.slogdet(weight)[1].astype(jnp.float32)
    return out, logdet


if __name__ == "__main__":
    key = jax.random.PRNGKey(0)
    k_w, k_x = jax.random.split(key)

    # Module __init__: weight = QR(randn(C, C)).Q, shape (C, C, 1, 1).
    N, C, H, W = 2, 4, 16, 16
    w0 = jax.random.normal(k_w, (C, C), dtype=jnp.float32)
    q, _ = jnp.linalg.qr(w0)
    weight = q  # squeezed (C, C) version of the (C, C, 1, 1) parameter

    x = jax.random.normal(k_x, (N, C, H, W), dtype=jnp.float32)

    out, logdet = inv_conv2d_forward(x, weight)
    out = jax.block_until_ready(out)
    logdet = jax.block_until_ready(logdet)

    # Sanity check against a plain-JAX reference of F.conv2d with a 1x1 kernel.
    ref = jnp.einsum("nihw,oi->nohw", x, weight)
    assert out.shape == (N, C, H, W)
    assert jnp.max(jnp.abs(out - ref)) < 1e-4
    assert logdet.shape == ()

    print("KERNEL_OK")
</pallas_src>

<mosaic_0001>
module attributes {stable_mosaic.version = 11 : i64} {
  func.func @_invconv_kernel_vpu(%arg0: i32, %arg1: i32, %arg2: memref<1x4x256xf32, #tpu.memory_space<vmem>>, %arg3: memref<4x4xf32, #tpu.memory_space<vmem>>, %arg4: memref<1x4x256xf32, #tpu.memory_space<vmem>>) attributes {dimension_semantics = [#tpu.dimension_semantics<parallel>, #tpu.dimension_semantics<parallel>], iteration_bounds = array<i64: 2, 1>, scalar_prefetch = 0 : i64, scratch_operands = 0 : i64, tpu.core_type = #tpu.core_type<tc>, window_params = [{transform_indices = @transform_0, window_bounds = array<i64: 1, 4, 256>}, {pipeline_mode = #tpu.pipeline_mode<synchronous>, transform_indices = @transform_1, window_bounds = array<i64: 4, 4>}, {transform_indices = @transform_2, window_bounds = array<i64: 1, 4, 256>}]} {
    %c0 = arith.constant 0 : index
    %c0_0 = arith.constant 0 : index
    %c0_1 = arith.constant 0 : index
    %0 = vector.load %arg2[%c0, %c0_0, %c0_1] : memref<1x4x256xf32, #tpu.memory_space<vmem>>, vector<1x4x256xf32>
    %1 = vector.shape_cast %0 : vector<1x4x256xf32> to vector<4x256xf32>
    %c0_2 = arith.constant 0 : index
    %c0_3 = arith.constant 0 : index
    %2 = vector.load %arg3[%c0_2, %c0_3] : memref<4x4xf32, #tpu.memory_space<vmem>>, vector<4x4xf32>
    %3 = vector.extract_strided_slice %2 {offsets = [0, 0], sizes = [4, 1], strides = [1, 1]} : vector<4x4xf32> to vector<4x1xf32>
    %4 = vector.extract_strided_slice %1 {offsets = [0, 0], sizes = [1, 256], strides = [1, 1]} : vector<4x256xf32> to vector<1x256xf32>
    %5 = vector.broadcast %3 : vector<4x1xf32> to vector<4x256xf32>
    %6 = vector.broadcast %4 : vector<1x256xf32> to vector<4x256xf32>
    %7 = arith.mulf %5, %6 : vector<4x256xf32>
    %8 = vector.extract_strided_slice %2 {offsets = [0, 1], sizes = [4, 1], strides = [1, 1]} : vector<4x4xf32> to vector<4x1xf32>
    %9 = vector.extract_strided_slice %1 {offsets = [1, 0], sizes = [1, 256], strides = [1, 1]} : vector<4x256xf32> to vector<1x256xf32>
    %10 = vector.broadcast %8 : vector<4x1xf32> to vector<4x256xf32>
    %11 = vector.broadcast %9 : vector<1x256xf32> to vector<4x256xf32>
    %12 = arith.mulf %10, %11 : vector<4x256xf32>
    %13 = arith.addf %7, %12 : vector<4x256xf32>
    %14 = vector.extract_strided_slice %2 {offsets = [0, 2], sizes = [4, 1], strides = [1, 1]} : vector<4x4xf32> to vector<4x1xf32>
    %15 = vector.extract_strided_slice %1 {offsets = [2, 0], sizes = [1, 256], strides = [1, 1]} : vector<4x256xf32> to vector<1x256xf32>
    %16 = vector.broadcast %14 : vector<4x1xf32> to vector<4x256xf32>
    %17 = vector.broadcast %15 : vector<1x256xf32> to vector<4x256xf32>
    %18 = arith.mulf %16, %17 : vector<4x256xf32>
    %19 = arith.addf %13, %18 : vector<4x256xf32>
    %20 = vector.extract_strided_slice %2 {offsets = [0, 3], sizes = [4, 1], strides = [1, 1]} : vector<4x4xf32> to vector<4x1xf32>
    %21 = vector.extract_strided_slice %1 {offsets = [3, 0], sizes = [1, 256], strides = [1, 1]} : vector<4x256xf32> to vector<1x256xf32>
    %22 = vector.broadcast %20 : vector<4x1xf32> to vector<4x256xf32>
    %23 = vector.broadcast %21 : vector<1x256xf32> to vector<4x256xf32>
    %24 = arith.mulf %22, %23 : vector<4x256xf32>
    %25 = arith.addf %19, %24 : vector<4x256xf32>
    %c0_4 = arith.constant 0 : index
    %c0_5 = arith.constant 0 : index
    %c0_6 = arith.constant 0 : index
    %26 = vector.load %arg4[%c0_4, %c0_5, %c0_6] : memref<1x4x256xf32, #tpu.memory_space<vmem>>, vector<1x4x256xf32>
    %27 = vector.shape_cast %26 : vector<1x4x256xf32> to vector<4x256xf32>
    %28 = vector.shape_cast %25 : vector<4x256xf32> to vector<1x4x256xf32>
    tpu.vector_store %arg4[%c0_4, %c0_5, %c0_6], %28 {strides = array<i32>} : memref<1x4x256xf32, #tpu.memory_space<vmem>>, vector<1x4x256xf32>,
    return
  }
  func.func @transform_0(%arg0: i32, %arg1: i32) -> (i32, i32, i32) {
    %c0_i32 = arith.constant 0 : i32
    %c0_i32_0 = arith.constant 0 : i32
    return %arg0, %c0_i32, %arg1 : i32, i32, i32
  }
  func.func @transform_1(%arg0: i32, %arg1: i32) -> (i32, i32) {
    %c0_i32 = arith.constant 0 : i32
    %c0_i32_0 = arith.constant 0 : i32
    %c0_i32_1 = arith.constant 0 : i32
    return %c0_i32, %c0_i32_0 : i32, i32
  }
  func.func @transform_2(%arg0: i32, %arg1: i32) -> (i32, i32, i32) {
    %c0_i32 = arith.constant 0 : i32
    %c0_i32_0 = arith.constant 0 : i32
    return %arg0, %c0_i32, %arg1 : i32, i32, i32
  }
}

</mosaic_0001>

<bundles_post_ra>
// kernel: tpu_custom_call.1
= control target key start
LH: loop header
LB: loop body
LE: loop exit
PB: predicated region body
PF: predicated region fallthrough
CT: control target
= control target key end

     0   :  { %7 = vsyncpa [#allocation3], 0  ;;  %s904_s0 = inlined_call_operand.hbm [shape: f32[2,4,256], index: 0, kind: input, shape index: {}]   ;;  %s905_s1 = inlined_call_operand.hbm [shape: f32[4,4], index: 1, kind: input, shape index: {}]   ;;  %s906_s2 = inlined_call_operand.hbm [shape: f32[2,4,256], index: 2, kind: output, shape index: {}]  }
   0x1   :  { %9 = vsyncpa [#allocation3 + $0x1], 0 }
   0x2   :  { %10 = vsyncpa [#allocation6], 0 }
   0x3   :  { %11 = vsyncpa [#allocation4], 0 }
   0x4   :  { %13 = vsyncpa [#allocation4 + $0x1], 0  ;;  %s684_s9 = smov 0   ;;  %s686_s10 = smov 0  }
   0x5   :  { %s688_s11 = smov 0   ;;  %s690_s12 = smov 0  }
   0x6   :  { %s692_s13 = smov 0   ;;  %s694_s14 = smov 0  }
   0x7 LB: > { %s415_s15 = sadd.s32 4294967295, %s660_s14   ;;  %s416_s16 = sadd.s32 4294967294, %s660_s14   ;;  %s660_s14 = sphi %s694_s14, %s19_s14   ;;  %s656_s13 = sphi %s692_s13, %s931_s13   ;;  %s652_s12 = sphi %s690_s12, %s930_s12   ;;  %s648_s11 = sphi %s688_s11, %s929_s11   ;;  %s644_s10 = sphi %s686_s10, %s928_s10   ;;  %s640_s9 = sphi %s684_s9, %s927_s9  }
   0x8   : > { %p53_p0 = scmp.ne.s32.totalorder %s644_s10, %s640_s9  ;;  %p718_p1 = scmp.eq.s32.totalorder %s415_s15, 0 }
   0x9   : > { %p722_p2 = scmp.eq.s32.totalorder %s415_s15, 1  ;;  %p106_p3 = scmp.eq.s32.totalorder %s416_s16, 1 }
   0xa   : > { %s911_s17 = scalar_select %p718_p1, 1, 0 }
   0xb   : > { %s912_s18 = scalar_select %p722_p2, 1, 0 }
   0xc   : > { %p728_p4 = por %p718_p1, %p53_p0  ;;  %p417_p5 = scmp.ge.s32.totalorder %s660_s14, 1 }
   0xd   : > { %p733_p6 = por %p106_p3, %p53_p0  ;;  %p113_p7 = scmp.lt.s32.totalorder %s660_s14, 3 }
   0xe   : > { %s913_s19 = scalar_select %p728_p4, 1, 0 }
   0xf   : > { %s914_s20 = scalar_select %p733_p6, 1, 0 }
  0x10   : > { %p738_p8 = pnand %p417_p5, %p113_p7  ;;  %s662_s22 = smov [#allocation5]  }
  0x11   : > { %s126_s23 = sshll.u32 %s662_s22, 4  ;;  %s31_s25 = sadd.s32 1, %s656_s13  ;;  %s127_s23 = int_to_ptr.vmem [resolvable:$true] %s126_s23 }
  0x12   : > { %s915_s21 = scalar_select %p738_p8, 1, 0 }
  0x13   : > { %p442_p10 = pneg %p738_p8  ;;  %s40_s26 = sadd.s32 1, %s648_s11 }
  0x14   : > { %p753_p12 = scmp.ge.s32.totalorder %s31_s25, 2  ;;  %s516_s30 = scalar_lea.hbm %s905_s1, 64 }
  0x15   : > { %p747_p11 = pnand %p442_p10, %p718_p1  ;;  %p517_p13 = scmp.ne.s32.totalorder %s905_s1, %s516_s30 }
  0x16   : > { %s917_s27 = scalar_select %p753_p12, 1, 0 }
  0x17   : > { %p518_p0 = pneg %p747_p11  ;;  %p523_p7 = scmp.lt.u32.totalorder %s516_s30, %s905_s1 }
  0x19   : > { %p519_p3 = pnand %p518_p0, %p517_p13 }
  0x1b   : > { %p520_p5 = pneg %p519_p3 }
  0x1d   : > { %p525_p10 = pnand %p523_p7, %p520_p5 }
  0x1f   : > { %528 = shalt.err (!%p525_p10)
}
  0x20   : > { %s529_s7 = scalar_lea.vmem %s127_s23, 64  ;;  %p537_p4 = scmp.lt.s32.totalorder %s127_s23, %s127_s23 }
  0x21   : > { %p530_p9 = scmp.ne.s32.totalorder %s127_s23, %s529_s7  ;;  %p538_p8 = scmp.lt.s32.totalorder %s529_s7, %s529_s7 }
  0x23   : > { %p532_p6 = pnand %p530_p9, %p518_p0  ;;  %p539_p2 = por %p538_p8, %p537_p4 }
  0x25   : > { %p533_p1 = pneg %p532_p6 }
  0x27   : > { %p540_p12 = pnand %p539_p2, %p533_p1 }
  0x29   : > { %543 = shalt.err (!%p540_p12)
}
  0x2a   : > { %445 = dma.hbm_to_vmem [thread:$0]  (!%p747_p11), %s905_s1, 64, %s127_s23, [#allocation6]  }
  0x2b   : > { %p918_p4 = scmp.ne.s32.totalorder %s917_s27, 0  ;;  %p47_p1 = scmp.ne.s32.totalorder %s648_s11, %s644_s10 }
  0x2c   : > { %p48_p2 = scmp.eq.s32.totalorder %s660_s14, 0  ;;  %p455_p6 = scmp.lt.s32.totalorder %s660_s14, 2 }
  0x2d   : > { %s933_s25 = smov (%p918_p4, %s31_s25), 0  ;;  %p919_p12 = scmp.ne.s32.totalorder %s912_s18, 0 }
  0x2e   : > { %s35_s16 = ssub.s32 %s656_s13, %s933_s25  ;;  %p49_p9 = por %p48_p2, %p47_p1 }
  0x2f   : > { %p38_p8 = scmp.eq.s32.totalorder %s35_s16, 0  ;;  %p785_p13 = por %p919_p12, %p47_p1 }
  0x30   : > { %s137_s24 = sand.u32 1, %s648_s11   ;;  %s432_s27 = sshll.u32 %s656_s13, 7 }
  0x31   : > { %s793_s28 = scalar_select %p38_p8, %s648_s11, %s40_s26  }
  0x32   : > { %s420_s23 = sshll.u32 %s137_s24, 3  ;;  %s799_s3 = scalar_lea.hbm %s904_s0, %s432_s27 }
  0x33   : > { %s141_s18 = scalar_lea.vmem [#allocation2], %s420_s23  ;;  %p803_p11 = pnand %p455_p6, %p49_p9 }
  0x34   : > { %s151_s4 = sshll.u32 %s141_s18, 4  ;;  %s138_s26 = scalar_lea.sflag [#allocation3], %s137_s24  ;;  %s801_s4 = int_to_ptr.vmem [resolvable:$true] %s151_s4 }
  0x35   : > { %s544_s6 = scalar_lea.hbm %s799_s3, 128  ;;  %p546_p3 = pneg %p803_p11 }
  0x36   : > { %p545_p0 = scmp.ne.s32.totalorder %s799_s3, %s544_s6  ;;  %s549_s15 = scalar_lea.hbm %s904_s0, 256 }
  0x37   : > { %p550_p10 = scmp.lt.u32.totalorder %s799_s3, %s904_s0  ;;  %p551_p4 = scmp.lt.u32.totalorder %s549_s15, %s544_s6 }
  0x38   : > { %p547_p5 = pnand %p546_p3, %p545_p0  ;;  %p553_p2 = scmp.lt.u32.totalorder %s544_s6, %s799_s3 }
  0x39   : > { %p552_p1 = por %p551_p4, %p550_p10 }
  0x3a   : > { %p548_p7 = pneg %p547_p5 }
  0x3b   : > { %p554_p6 = por %p553_p2, %p552_p1 }
  0x3d   : > { %p555_p8 = pnand %p554_p6, %p548_p7 }
  0x3f   : > { %558 = shalt.err (!%p555_p8)
}
  0x40   : > { %s559_s24 = scalar_lea.vmem %s801_s4, 128  ;;  %s663_s27 = smov [#allocation2]  }
  0x41   : > { %p560_p9 = scmp.ne.s32.totalorder %s801_s4, %s559_s24  ;;  %s564_s29 = sshll.u32 %s663_s27, 4  ;;  %s565_s29 = int_to_ptr.vmem [resolvable:$false] %s564_s29 }
  0x42   : > { %s566_s30 = scalar_lea.vmem %s565_s29, 256  ;;  %p567_p5 = scmp.lt.s32.totalorder %s801_s4, %s565_s29 }
  0x43   : > { %p562_p12 = pnand %p560_p9, %p546_p3  ;;  %p568_p10 = scmp.lt.s32.totalorder %s566_s30, %s559_s24 }
  0x45   : > { %p563_p0 = pneg %p562_p12  ;;  %p569_p4 = por %p568_p10, %p567_p5 }
  0x47   : > { %p570_p1 = pnand %p569_p4, %p563_p0 }
  0x49   : > { %573 = shalt.err (!%p570_p1)
}
  0x4a   : > { %449 = dma.hbm_to_vmem [thread:$0]  (!%p803_p11), %s799_s3, 128, %s801_s4, %s138_s26  }
  0x4b   : > { %p922_p7 = scmp.ne.s32.totalorder %s915_s21, 0 }
  0x4c   : > { %s835_s18 = sand.u32 (!%p922_p7), 1, %s644_s10   ;;  %p923_p3 = scmp.ne.s32.totalorder (!%p922_p7), %s913_s19, 0 }
  0x4d   : > { %160 = sbr.rel (%p922_p7) target bundleno = 247 (0xf7), region = 28  ;;  %s424_s6 = sshll.u32 (!%p922_p7), %s835_s18, 3 }
  0x4e   : > { %s163_s7 = scalar_lea.sflag (!%p922_p7), [#allocation3], %s835_s18  ;;  %s166_s8 = scalar_lea.vmem (!%p922_p7), [#allocation2], %s424_s6 }
  0x54   : > { %627 = dma.done.wait (%p923_p3), %s163_s7, 128  }
  0x55   : > { %629 = vsyncadd (%p923_p3), %s163_s7, 4294967168  ;;  %p924_p11 = scmp.ne.s32.totalorder %s911_s17, 0 }
  0x57   : > { %631 = dma.done.wait (%p924_p11), [#allocation6], 64  }
  0x58   : > { %633 = vsyncadd (%p924_p11), [#allocation6], 4294967232  ;;  %v664_v0 = vmov 0   ;;  %v665_v1 = vmov 2   ;;  %v194_v2 = vld [vmem:[#allocation5] sm:$0xf]  ;;  %v201_v5 = vlaneseq }
  0x59   : > { %511 = vset.pattern.permute.xlu0 %v664_v0  ;;  %513 = vset.pattern.permute.xlu1 %v665_v1  ;;  %v666_v3 = vmov 1   ;;  %v667_v4 = vmov 3   ;;  %v193_v11 = vld [vmem:[%s166_s8] sm:$0xff]  ;;  %s433_s17 = sshll.u32 %s652_s12, 7  ;;  %s190_s19 = scalar_lea.vmem [#allocation7], %s424_s6 }
  0x5a   : > { %197 = vperm.xlu0 %511, %v194_v2   ;;  %248 = vperm.xlu1 %513, %v194_v2   ;;  %v202_v6 = vshrl.u32 %v201_v5, 7  ;;  %s321_s21 = sshll.u32 %s190_s19, 4  ;;  %s855_s5 = scalar_lea.hbm %s906_s2, %s433_s17  ;;  %s857_s21 = int_to_ptr.vmem [resolvable:$true] %s321_s21 }
  0x5b   : > { %s305_s26 = scalar_lea.sflag [#allocation4], %s835_s18  ;;  %s574_s15 = scalar_lea.vmem %s857_s21, 128 }
  0x5c   : > { %v203_v7 = vsub.s32 0, %v202_v6  ;;  %v207_v8 = vsub.s32 4, %v202_v6  ;;  %v227_v9 = vsub.s32 1, %v202_v6  ;;  %v231_v10 = vsub.s32 5, %v202_v6  ;;  %p575_p2 = scmp.ne.s32.totalorder %s857_s21, %s574_s15  ;;  %s668_s12 = smov [#allocation7]  }
  0x5d   : > { %v253_v12 = vsub.s32 2, %v202_v6  ;;  %v257_v13 = vsub.s32 6, %v202_v6  ;;  %v279_v14 = vsub.s32 3, %v202_v6  ;;  %v283_v15 = vsub.s32 7, %v202_v6  ;;  %s578_s16 = sshll.u32 %s668_s12, 4  ;;  %s579_s16 = int_to_ptr.vmem [resolvable:$false] %s578_s16 }
  0x5e   : > { %512 = vset.pattern.permute.xlu0 %v666_v3  ;;  %514 = vset.pattern.permute.xlu1 %v667_v4  ;;  %v204_v16 = vrot.slane %v193_v11, %v203_v7  ;;  %v208_v17 = vrot.slane %v193_v11, %v207_v8  ;;  %v228_v18 = vrot.slane %v193_v11, %v227_v9  ;;  %p576_p6 = pnand %p575_p2, %p785_p13  ;;  %s580_s23 = scalar_lea.vmem %s579_s16, 256 }
  0x5f   : > { %222 = vperm.xlu0 %512, %v194_v2   ;;  %274 = vperm.xlu1 %514, %v194_v2   ;;  %v232_v19 = vrot.slane %v193_v11, %v231_v10  ;;  %v254_v20 = vrot.slane %v193_v11, %v253_v12  ;;  %v258_v21 = vrot.slane %v193_v11, %v257_v13  ;;  %p581_p9 = scmp.lt.s32.totalorder %s857_s21, %s579_s16  ;;  %p582_p12 = scmp.lt.s32.totalorder %s580_s23, %s574_s15 }
  0x60   : > { %v280_v24 = vrot.slane %v193_v11, %v279_v14  ;;  %v284_v25 = vrot.slane %v193_v11, %v283_v15  ;;  %v214_v26 = vrot.slane %v204_v16, %v203_v7  ;;  %v218_v27 = vrot.slane %v208_v17, %v203_v7  ;;  %p577_p8 = pneg %p576_p6 }
  0x61   : > { %v238_v28 = vrot.slane %v228_v18, %v227_v9  ;;  %v242_v29 = vrot.slane %v232_v19, %v227_v9  ;;  %v264_v30 = vrot.slane %v254_v20, %v253_v12  ;;  %v268_v31 = vrot.slane %v258_v21, %v253_v12  ;;  %p583_p0 = por %p582_p12, %p581_p9 }
  0x62   : > { %v290_v32 = vrot.slane %v280_v24, %v279_v14  ;;  %v294_v33 = vrot.slane %v284_v25, %v279_v14 }
  0x63   : > { %515 = vset.pattern.permute.xlu0 %v667_v4  ;;  %p584_p5 = pnand %p583_p0, %p577_p8 }
  0xd9   : > { %v198_v22 = vpop.permute.xlu0 %197  ;;  %v249_v23 = vpop.permute.xlu1 %248 }
  0xda   : > { %v219_v36 = vmul.f32 %v214_v26, %v198_v22  ;;  %v220_v37 = vmul.f32 %v218_v27, %v198_v22  ;;  %v269_v40 = vmul.f32 %v264_v30, %v249_v23  ;;  %v270_v41 = vmul.f32 %v268_v31, %v249_v23 }
  0xde   : > { %v223_v34 = vpop.permute.xlu0 %222  ;;  %v275_v35 = vpop.permute.xlu1 %274 }
  0xdf   : > { %v243_v38 = vmul.f32 %v238_v28, %v223_v34  ;;  %v244_v39 = vmul.f32 %v242_v29, %v223_v34  ;;  %v295_v44 = vmul.f32 %v290_v32, %v275_v35  ;;  %v296_v45 = vmul.f32 %v294_v33, %v275_v35 }
  0xe1   : > { %v245_v42 = vadd.f32 %v243_v38, %v219_v36  ;;  %v246_v43 = vadd.f32 %v244_v39, %v220_v37 }
  0xe3   : > { %v271_v46 = vadd.f32 %v269_v40, %v245_v42  ;;  %v272_v47 = vadd.f32 %v270_v41, %v246_v43 }
  0xe5   : > { %v297_v48 = vadd.f32 %v295_v44, %v271_v46  ;;  %v298_v49 = vadd.f32 %v296_v45, %v272_v47 }
  0xe7   : > { %v301_v50 = vcombine.low %v297_v48, %v298_v49 }
  0xe9   : > { %303 = vst [vmem:[%s190_s19] sm:$0xff] %v301_v50 }
  0xea   : > { %587 = shalt.err (!%p584_p5)
}
  0xeb   : > { %s588_s24 = scalar_lea.hbm %s855_s5, 128  ;;  %s592_s30 = scalar_lea.hbm %s906_s2, 256 }
  0xec   : > { %p589_p10 = scmp.ne.s32.totalorder %s855_s5, %s588_s24  ;;  %p593_p7 = scmp.lt.u32.totalorder %s855_s5, %s906_s2 }
  0xed   : > { %p594_p3 = scmp.lt.u32.totalorder %s592_s30, %s588_s24  ;;  %p596_p2 = scmp.lt.u32.totalorder %s588_s24, %s855_s5 }
  0xee   : > { %p590_p4 = pnand %p589_p10, %p785_p13 }
  0xef   : > { %p595_p11 = por %p594_p3, %p593_p7 }
  0xf0   : > { %p591_p1 = pneg %p590_p4 }
  0xf1   : > { %p597_p6 = por %p596_p2, %p595_p11 }
  0xf3   : > { %p598_p8 = pnand %p597_p6, %p591_p1 }
  0xf5   : > { %601 = shalt.err (!%p598_p8)
}
  0xf6   : > { %440 = dma.vmem_to_hbm [thread:$0]  (%p785_p13), %s857_s21, 128, %s855_s5, %s305_s26  }
  0xf7 PF: > { %s333_s7 = sand.u32 1, %s640_s9   ;;  %p925_p9 = scmp.ne.s32.totalorder %s914_s20, 0 }
  0xf8   : > { %p926_p12 = scmp.ge.s32.totalorder %s660_s14, 2  ;;  %s334_s8 = scalar_lea.sflag [#allocation4], %s333_s7 }
  0xfa   : > { %p451_p0 = pnand %p926_p12, %p925_p9 }
  0xfc   : > { %635 = dma.done.wait (!%p451_p0), %s334_s8, 128  }
  0xfd   : > { %637 = vsyncadd (!%p451_p0), %s334_s8, 4294967168  ;;  %s19_s14 = sadd.s32 1, %s660_s14   ;;  %s927_s9 = smov %s644_s10 }
  0xfe   : > { %p16_p5 = scmp.ge.s32.totalorder %s19_s14, 4   ;;  %s928_s10 = smov %s648_s11 }
  0xff   : > { %s929_s11 = smov %s793_s28  ;;  %s930_s12 = smov %s656_s13 }
 0x100   : > { %s931_s13 = smov %s933_s25  ;;  %18 = sbr.rel (!%p16_p5) target bundleno = 7 (0x7), region = 77 }
 0x107   :  { %339 = vsyncpa [#allocation3], 1 }
 0x108   :  { %341 = vsyncpa [#allocation3 + $0x1], 1 }
 0x109   :  { %342 = vsyncpa [#allocation6], 1 }
 0x10a   :  { %343 = vsyncpa [#allocation4], 1 }
 0x10b   :  { %345 = vsyncpa [#allocation4 + $0x1], 1 }

</bundles_post_ra>
